<compile_context>
chip_gen: v6e
topology: v6e:2x2x1
jax: 0.10.0
libtpu: 0.0.40
codegen_flags: <defaults>
</compile_context>

<pallas_src>
import functools

import jax
import jax.numpy as jnp
from jax import lax
from jax.experimental import pallas as pl
from jax.experimental.pallas import tpu as pltpu

_NEG_BIG = -1e30  # used instead of -inf for masked logits


def _joint_loss_kernel(rep_ref, xr_ref, xo_ref, out_ref,
                       rows_s, m_sc, l_sc, *,
                       batch_size, inv_tau, cosine_similarity,
                       use_analytic_max, col_tile):
    n = batch_size
    n2 = 2 * n
    c = pl.program_id(0)
    num_c = pl.num_programs(0)

    # ---- step 0: build the scaled row matrix once; init the online-LSE state ----
    @pl.when(c == 0)
    def _init():
        rep_f32 = rep_ref[...].astype(jnp.float32)                      # (2B, D)
        if cosine_similarity:
            sq = jnp.sum(rep_f32 * rep_f32, axis=-1, keepdims=True)     # (2B, 1)
            # rsqrt rides the EUP slot; sqrt(1/tau) folds the temperature in.
            scale = lax.rsqrt(jnp.maximum(sq, 1e-16)) * (inv_tau ** 0.5)
        else:
            scale = inv_tau ** 0.5
        rows_s[...] = rep_f32 * scale        # logits == rows_s @ rows_s.T
        m_sc[...] = jnp.full(m_sc.shape, _NEG_BIG, jnp.float32)
        l_sc[...] = jnp.zeros_like(l_sc)

    # ---- every step: one (2B, col_tile) block of logits + online logsumexp ----
    q = rows_s[...]                                                     # (2B, D) f32
    start = pl.multiple_of(c * col_tile, col_tile)
    kblk = rows_s[pl.ds(start, col_tile), :]                            # (tc, D) f32
    # Contract last dims of both operands (no explicit rep.T value).
    logits = lax.dot_general(q, kblk, (((1,), (1,)), ((), ())),
                             preferred_element_type=jnp.float32)        # (2B, tc)
    row = lax.broadcasted_iota(jnp.int32, (n2, col_tile), 0)
    col = lax.broadcasted_iota(jnp.int32, (n2, col_tile), 1) + c * col_tile
    masked = jnp.where(row == col, _NEG_BIG, logits)                    # diag-only mask

    if use_analytic_max:
        # Cosine logits are bounded above by 1/tau; off-diag terms are bounded
        # below by exp(-2/tau) (>= ~1e-29 for tau >= 0.03), so no max pass needed.
        l_sc[...] += jnp.sum(jnp.exp(masked - inv_tau), axis=-1, keepdims=True)
    else:
        blk_max = jnp.max(masked, axis=-1, keepdims=True)               # (2B, 1)
        m_new = jnp.maximum(m_sc[...], blk_max)
        alpha = jnp.exp(m_sc[...] - m_new)
        l_sc[...] = l_sc[...] * alpha + jnp.sum(jnp.exp(masked - m_new),
                                                axis=-1, keepdims=True)
        m_sc[...] = m_new

    # ---- last step: cheap terms + finalize ----
    @pl.when(c == num_c - 1)
    def _finalize():
        if use_analytic_max:
            lse = inv_tau + jnp.log(l_sc[...])                          # (2B, 1)
        else:
            lse = m_sc[...] + jnp.log(l_sc[...])                        # (2B, 1)

        # Positive logits: sum_i pos_i telescopes to 2 * sum(rows_s[:B]*rows_s[B:])
        # (rows_s already carries the normalization and the 1/tau fold).
        rs = rows_s[...]
        pos_sum = 2.0 * jnp.sum(rs[:n, :] * rs[n:, :])
        closs = jnp.sum(lse) - pos_sum

        # Reconstruction loss: F.mse_loss, mean over the true element count.
        xr = xr_ref[...].astype(jnp.float32)
        xo = xo_ref[...].astype(jnp.float32)
        diff = xr - xo
        f_true = xr_ref.shape[-1]
        recon_loss = jnp.sum(diff * diff) * (1.0 / float(n2 * f_true))

        # z-reconstruction loss: sum((zi - zj)^2) / B on the RAW representation.
        rep_f32 = rep_ref[...].astype(jnp.float32)
        zd = rep_f32[:n, :] - rep_f32[n:, :]
        zrecon_loss = jnp.sum(zd * zd) * (1.0 / float(n))

        out_ref[0, 0] = recon_loss + closs + zrecon_loss


def _pick_col_tile(n2):
    """Largest key-column tile: single pass for small 2B, streamed tiles otherwise."""
    if n2 <= 512:
        return n2
    # Keep the (2B, tc) f32 block around ~2 MiB; tc must divide 2B and be a
    # multiple of 8.
    budget = max(8, (512 * 1024) // n2)
    best = None
    t = 8
    while t <= min(budget, n2):
        if n2 % t == 0:
            best = t
        t *= 2
    return best if best is not None else n2   # odd 2B: fall back to one pass


def joint_loss(representation, xrecon, xorig, *, batch_size, tau,
               cosine_similarity=True, col_tile=None):
    """Pallas implementation of JointLoss.forward. Returns a scalar float32."""
    n2 = 2 * batch_size
    assert representation.shape[0] == n2
    assert xrecon.shape == xorig.shape and xrecon.shape[0] == n2

    d = representation.shape[1]
    f = xrecon.shape[1]

    if col_tile is None:
        col_tile = _pick_col_tile(n2)
    assert n2 % col_tile == 0 and (col_tile % 8 == 0 or col_tile == n2), \
        "col_tile must divide 2*batch_size and be a multiple of 8 (or the full extent)"
    num_kt = n2 // col_tile

    use_analytic_max = bool(cosine_similarity) and float(tau) >= 0.03

    kernel = functools.partial(
        _joint_loss_kernel,
        batch_size=batch_size,
        inv_tau=1.0 / float(tau),
        cosine_similarity=bool(cosine_similarity),
        use_analytic_max=use_analytic_max,
        col_tile=col_tile,
    )

    # Rough live-VMEM estimate (lane-padded); raise the scoped limit only when the
    # defaults (16 MiB v5e / 32 MiB v6e,v7x) could be tight.  Cap at 48 MiB (v7x
    # has 64 MiB physical per TensorCore).
    d_lanes = max(d, 128)
    f_lanes = max(f, 128)
    est = 4 * n2 * (6 * col_tile + 4 * d_lanes + 6 * f_lanes + 2 * 128)
    vmem_limit = None
    if est > 12 * 1024 * 1024:
        vmem_limit = min(48 * 1024 * 1024, max(32 * 1024 * 1024, 2 * est))

    cost = pl.CostEstimate(
        flops=2 * n2 * n2 * d + 8 * n2 * (d + f),
        transcendentals=n2 * n2 + 2 * n2,
        bytes_accessed=4 * n2 * (d + 2 * f) + 4,
    )

    out = pl.pallas_call(
        kernel,
        grid=(num_kt,),
        out_shape=jax.ShapeDtypeStruct((1, 1), jnp.float32),
        in_specs=[
            pl.BlockSpec(memory_space=pltpu.MemorySpace.VMEM),   # representation
            pl.BlockSpec(memory_space=pltpu.MemorySpace.VMEM),   # xrecon
            pl.BlockSpec(memory_space=pltpu.MemorySpace.VMEM),   # xorig
        ],
        out_specs=pl.BlockSpec(memory_space=pltpu.MemorySpace.SMEM),
        scratch_shapes=[
            pltpu.VMEM((n2, d), jnp.float32),   # normalized / tau-folded rows
            pltpu.VMEM((n2, 1), jnp.float32),   # m (online max; unused on analytic path)
            pltpu.VMEM((n2, 1), jnp.float32),   # l (online sum of exp)
        ],
        compiler_params=pltpu.CompilerParams(
            dimension_semantics=("arbitrary",),   # column axis is a reduction
            vmem_limit_bytes=vmem_limit,
        ),
        cost_estimate=cost,
    )(representation, xrecon, xorig)
    return out[0, 0]


# ---------------- pure-JAX reference (torch-faithful, for a sanity check) ----------------
def _joint_loss_ref(representation, xrecon, xorig, *, batch_size, tau,
                    cosine_similarity=True):
    rep = representation.astype(jnp.float32)
    xr = xrecon.astype(jnp.float32)
    xo = xorig.astype(jnp.float32)
    n = batch_size
    n2 = 2 * n

    recon_loss = jnp.mean((xr - xo) ** 2)

    if cosine_similarity:
        norm = jnp.linalg.norm(rep, axis=-1, keepdims=True)
        sim = (rep @ rep.T) / jnp.maximum(norm * norm.T, 1e-8)
    else:
        sim = rep @ rep.T
    logits = sim / tau
    idx = jnp.arange(n2)
    masked = jnp.where(idx[:, None] == idx[None, :], -jnp.inf, logits)
    lse = jax.scipy.special.logsumexp(masked, axis=-1)
    pos = logits[idx, (idx + n) % n2]
    closs = jnp.sum(lse - pos)

    zi, zj = rep[:n], rep[n:]
    zrecon_loss = jnp.sum((zi - zj) ** 2) / n

    return recon_loss + closs + zrecon_loss


if __name__ == "__main__":
    key = jax.random.PRNGKey(0)

    def make_inputs(k, batch_size, d_proj, d_feat):
        k1, k2, k3 = jax.random.split(k, 3)
        rep = jax.random.normal(k1, (2 * batch_size, d_proj), jnp.float32)
        xo = jax.random.normal(k2, (2 * batch_size, d_feat), jnp.float32)
        xr = xo + 0.1 * jax.random.normal(k3, (2 * batch_size, d_feat), jnp.float32)
        return rep, xr, xo

    # Cases cover: {analytic-max, online-max} x {single column pass, streamed tiles}.
    cases = [
        dict(batch_size=4, d=32, f=16, tau=0.1, cosine=True, col_tile=None),
        dict(batch_size=4, d=32, f=16, tau=0.1, cosine=False, col_tile=None),
        dict(batch_size=32, d=48, f=40, tau=0.1, cosine=True, col_tile=16),
        dict(batch_size=32, d=48, f=40, tau=0.1, cosine=False, col_tile=16),
    ]
    for i, cs in enumerate(cases):
        key, sub = jax.random.split(key)
        rep, xr, xo = make_inputs(sub, cs["batch_size"], cs["d"], cs["f"])
        got = joint_loss(rep, xr, xo, batch_size=cs["batch_size"], tau=cs["tau"],
                         cosine_similarity=cs["cosine"], col_tile=cs["col_tile"])
        got = jax.block_until_ready(got)
        want = _joint_loss_ref(rep, xr, xo, batch_size=cs["batch_size"],
                               tau=cs["tau"], cosine_similarity=cs["cosine"])
        assert jnp.allclose(got, want, rtol=1e-4, atol=1e-4), (i, got, want)

    print("KERNEL_OK")
</pallas_src>

<mosaic_0001>
module attributes {stable_mosaic.version = 11 : i64} {
  func.func @_joint_loss_kernel(%arg0: i32, %arg1: memref<8x32xf32, #tpu.memory_space<vmem>>, %arg2: memref<8x16xf32, #tpu.memory_space<vmem>>, %arg3: memref<8x16xf32, #tpu.memory_space<vmem>>, %arg4: memref<1x1xf32, #tpu.memory_space<smem>>, %arg5: memref<8x32xf32, #tpu.memory_space<vmem>>, %arg6: memref<8x1xf32, #tpu.memory_space<vmem>>, %arg7: memref<8x1xf32, #tpu.memory_space<vmem>>) attributes {dimension_semantics = [#tpu.dimension_semantics<arbitrary>], iteration_bounds = array<i64: 1>, scalar_prefetch = 0 : i64, scratch_operands = 3 : i64, tpu.core_type = #tpu.core_type<tc>, window_params = [{pipeline_mode = #tpu.pipeline_mode<synchronous>, transform_indices = @transform_0, window_bounds = array<i64: 8, 32>}, {pipeline_mode = #tpu.pipeline_mode<synchronous>, transform_indices = @transform_1, window_bounds = array<i64: 8, 16>}, {pipeline_mode = #tpu.pipeline_mode<synchronous>, transform_indices = @transform_2, window_bounds = array<i64: 8, 16>}, {transform_indices = @transform_3, window_bounds = array<i64: 1, 1>}]} {
    %c0_i32 = arith.constant 0 : i32
    %0 = arith.cmpi eq, %arg0, %c0_i32 : i32
    %1 = arith.extui %0 : i1 to i32
    %c0_i32_0 = arith.constant 0 : i32
    %2 = arith.cmpi ne, %1, %c0_i32_0 : i32
    scf.if %2 {
      %c0_13 = arith.constant 0 : index
      %c0_14 = arith.constant 0 : index
      %28 = vector.load %arg1[%c0_13, %c0_14] : memref<8x32xf32, #tpu.memory_space<vmem>>, vector<8x32xf32>
      %29 = arith.mulf %28, %28 : vector<8x32xf32>
      %cst_15 = arith.constant dense<0.000000e+00> : vector<8xf32>
      %30 = vector.multi_reduction <add>, %29, %cst_15 [1] : vector<8x32xf32> to vector<8xf32>
      %31 = vector.shape_cast %30 : vector<8xf32> to vector<8x1xf32>
      %cst_16 = arith.constant 1.000000e-16 : f32
      %32 = vector.broadcast %cst_16 : f32 to vector<8x1xf32>
      %33 = arith.maximumf %31, %32 : vector<8x1xf32>
      %34 = math.rsqrt %33 : vector<8x1xf32>
      %cst_17 = arith.constant 3.1622777 : f32
      %35 = vector.broadcast %cst_17 : f32 to vector<8x1xf32>
      %36 = arith.mulf %34, %35 : vector<8x1xf32>
      %37 = vector.broadcast %36 : vector<8x1xf32> to vector<8x32xf32>
      %38 = arith.mulf %28, %37 : vector<8x32xf32>
      %c0_18 = arith.constant 0 : index
      %c0_19 = arith.constant 0 : index
      %39 = vector.load %arg5[%c0_18, %c0_19] : memref<8x32xf32, #tpu.memory_space<vmem>>, vector<8x32xf32>
      tpu.vector_store %arg5[%c0_18, %c0_19], %38 {strides = array<i32>} : memref<8x32xf32, #tpu.memory_space<vmem>>, vector<8x32xf32>,
      %cst_20 = arith.constant -1.000000e+30 : f32
      %40 = vector.broadcast %cst_20 : f32 to vector<8x1xf32>
      %c0_21 = arith.constant 0 : index
      %c0_22 = arith.constant 0 : index
      %41 = vector.load %arg6[%c0_21, %c0_22] : memref<8x1xf32, #tpu.memory_space<vmem>>, vector<8x1xf32>
      tpu.vector_store %arg6[%c0_21, %c0_22], %40 {strides = array<i32>} : memref<8x1xf32, #tpu.memory_space<vmem>>, vector<8x1xf32>,
      %cst_23 = arith.constant 0.000000e+00 : f32
      %42 = vector.broadcast %cst_23 : f32 to vector<8x1xf32>
      %c0_24 = arith.constant 0 : index
      %c0_25 = arith.constant 0 : index
      %43 = vector.load %arg7[%c0_24, %c0_25] : memref<8x1xf32, #tpu.memory_space<vmem>>, vector<8x1xf32>
      tpu.vector_store %arg7[%c0_24, %c0_25], %42 {strides = array<i32>} : memref<8x1xf32, #tpu.memory_space<vmem>>, vector<8x1xf32>,
    } else {
    }
    %c0 = arith.constant 0 : index
    %c0_1 = arith.constant 0 : index
    %3 = vector.load %arg5[%c0, %c0_1] : memref<8x32xf32, #tpu.memory_space<vmem>>, vector<8x32xf32>
    %c8_i32 = arith.constant 8 : i32
    %4 = arith.muli %arg0, %c8_i32 : i32
    %5 = tpu.assume_multiple %4, 8 : i32
    %6 = arith.index_cast %5 : i32 to index
    %c0_2 = arith.constant 0 : index
    %7 = vector.load %arg5[%6, %c0_2] : memref<8x32xf32, #tpu.memory_space<vmem>>, vector<8x32xf32>
    %cst = arith.constant dense<0.000000e+00> : vector<8x8xf32>
    %8 = tpu.matmul %3, %7, %cst {dimension_numbers = #tpu.dot_dimension_numbers<[1], [1], [0], [0], [0, 0, 1, 0], [], []>} : vector<8x32xf32>, vector<8x32xf32>, vector<8x8xf32> -> vector<8x8xf32>
    %9 = tpu.iota {dimensions = array<i32: 0>} : vector<8x8xi32>
    %10 = tpu.iota {dimensions = array<i32: 1>} : vector<8x8xi32>
    %c8_i32_3 = arith.constant 8 : i32
    %11 = arith.muli %arg0, %c8_i32_3 : i32
    %12 = vector.broadcast %11 : i32 to vector<8x8xi32>
    %13 = arith.addi %10, %12 : vector<8x8xi32>
    %14 = arith.cmpi eq, %9, %13 : vector<8x8xi32>
    %cst_4 = arith.constant -1.000000e+30 : f32
    %15 = vector.broadcast %cst_4 : f32 to vector<8x8xf32>
    %16 = arith.select %14, %15, %8 : vector<8x8xi1>, vector<8x8xf32>
    %c0_5 = arith.constant 0 : index
    %c0_6 = arith.constant 0 : index
    %17 = vector.load %arg7[%c0_5, %c0_6] : memref<8x1xf32, #tpu.memory_space<vmem>>, vector<8x1xf32>
    %cst_7 = arith.constant 1.000000e+01 : f32
    %18 = vector.broadcast %cst_7 : f32 to vector<8x8xf32>
    %19 = arith.subf %16, %18 : vector<8x8xf32>
    %20 = math.exp %19 : vector<8x8xf32>
    %cst_8 = arith.constant dense<0.000000e+00> : vector<8xf32>
    %21 = vector.multi_reduction <add>, %20, %cst_8 [1] : vector<8x8xf32> to vector<8xf32>
    %22 = vector.shape_cast %21 : vector<8xf32> to vector<8x1xf32>
    %23 = arith.addf %17, %22 : vector<8x1xf32>
    %c0_9 = arith.constant 0 : index
    %c0_10 = arith.constant 0 : index
    %24 = vector.load %arg7[%c0_9, %c0_10] : memref<8x1xf32, #tpu.memory_space<vmem>>, vector<8x1xf32>
    tpu.vector_store %arg7[%c0_9, %c0_10], %23 {strides = array<i32>} : memref<8x1xf32, #tpu.memory_space<vmem>>, vector<8x1xf32>,
    %c0_i32_11 = arith.constant 0 : i32
    %25 = arith.cmpi eq, %arg0, %c0_i32_11 : i32
    %26 = arith.extui %25 : i1 to i32
    %c0_i32_12 = arith.constant 0 : i32
    %27 = arith.cmpi ne, %26, %c0_i32_12 : i32
    scf.if %27 {
      %c0_13 = arith.constant 0 : index
      %c0_14 = arith.constant 0 : index
      %28 = vector.load %arg7[%c0_13, %c0_14] : memref<8x1xf32, #tpu.memory_space<vmem>>, vector<8x1xf32>
      %29 = math.log %28 : vector<8x1xf32>
      %cst_15 = arith.constant 1.000000e+01 : f32
      %30 = vector.broadcast %cst_15 : f32 to vector<8x1xf32>
      %31 = arith.addf %30, %29 : vector<8x1xf32>
      %c0_16 = arith.constant 0 : index
      %c0_17 = arith.constant 0 : index
      %32 = vector.load %arg5[%c0_16, %c0_17] : memref<8x32xf32, #tpu.memory_space<vmem>>, vector<8x32xf32>
      %33 = vector.extract_strided_slice %32 {offsets = [0, 0], sizes = [4, 32], strides = [1, 1]} : vector<8x32xf32> to vector<4x32xf32>
      %34 = vector.extract_strided_slice %32 {offsets = [4, 0], sizes = [4, 32], strides = [1, 1]} : vector<8x32xf32> to vector<4x32xf32>
      %35 = arith.mulf %33, %34 : vector<4x32xf32>
      %36 = vector.shape_cast %35 : vector<4x32xf32> to vector<1x4x32xf32>
      %cst_18 = arith.constant dense<0.000000e+00> : vector<1xf32>
      %37 = vector.multi_reduction <add>, %36, %cst_18 [1, 2] : vector<1x4x32xf32> to vector<1xf32>
      %38 = vector.shape_cast %37 : vector<1xf32> to vector<1x1x1xf32>
      %39 = vector.extract %38[0, 0, 0] : f32 from vector<1x1x1xf32>
      %cst_19 = arith.constant 2.000000e+00 : f32
      %40 = arith.mulf %cst_19, %39 : f32
      %41 = vector.shape_cast %31 : vector<8x1xf32> to vector<1x8x1xf32>
      %cst_20 = arith.constant dense<0.000000e+00> : vector<1xf32>
      %42 = vector.multi_reduction <add>, %41, %cst_20 [1, 2] : vector<1x8x1xf32> to vector<1xf32>
      %43 = vector.shape_cast %42 : vector<1xf32> to vector<1x1x1xf32>
      %44 = vector.extract %43[0, 0, 0] : f32 from vector<1x1x1xf32>
      %45 = arith.subf %44, %40 : f32
      %c0_21 = arith.constant 0 : index
      %c0_22 = arith.constant 0 : index
      %46 = vector.load %arg2[%c0_21, %c0_22] : memref<8x16xf32, #tpu.memory_space<vmem>>, vector<8x16xf32>
      %c0_23 = arith.constant 0 : index
      %c0_24 = arith.constant 0 : index
      %47 = vector.load %arg3[%c0_23, %c0_24] : memref<8x16xf32, #tpu.memory_space<vmem>>, vector<8x16xf32>
      %48 = arith.subf %46, %47 : vector<8x16xf32>
      %49 = arith.mulf %48, %48 : vector<8x16xf32>
      %50 = vector.shape_cast %49 : vector<8x16xf32> to vector<1x8x16xf32>
      %cst_25 = arith.constant dense<0.000000e+00> : vector<1xf32>
      %51 = vector.multi_reduction <add>, %50, %cst_25 [1, 2] : vector<1x8x16xf32> to vector<1xf32>
      %52 = vector.shape_cast %51 : vector<1xf32> to vector<1x1x1xf32>
      %53 = vector.extract %52[0, 0, 0] : f32 from vector<1x1x1xf32>
      %cst_26 = arith.constant 7.812500e-03 : f32
      %54 = arith.mulf %53, %cst_26 : f32
      %c0_27 = arith.constant 0 : index
      %c0_28 = arith.constant 0 : index
      %55 = vector.load %arg1[%c0_27, %c0_28] : memref<8x32xf32, #tpu.memory_space<vmem>>, vector<8x32xf32>
      %56 = vector.extract_strided_slice %55 {offsets = [0, 0], sizes = [4, 32], strides = [1, 1]} : vector<8x32xf32> to vector<4x32xf32>
      %57 = vector.extract_strided_slice %55 {offsets = [4, 0], sizes = [4, 32], strides = [1, 1]} : vector<8x32xf32> to vector<4x32xf32>
      %58 = arith.subf %56, %57 : vector<4x32xf32>
      %59 = arith.mulf %58, %58 : vector<4x32xf32>
      %60 = vector.shape_cast %59 : vector<4x32xf32> to vector<1x4x32xf32>
      %cst_29 = arith.constant dense<0.000000e+00> : vector<1xf32>
      %61 = vector.multi_reduction <add>, %60, %cst_29 [1, 2] : vector<1x4x32xf32> to vector<1xf32>
      %62 = vector.shape_cast %61 : vector<1xf32> to vector<1x1x1xf32>
      %63 = vector.extract %62[0, 0, 0] : f32 from vector<1x1x1xf32>
      %cst_30 = arith.constant 2.500000e-01 : f32
      %64 = arith.mulf %63, %cst_30 : f32
      %65 = arith.addf %54, %45 : f32
      %66 = arith.addf %65, %64 : f32
      %c0_31 = arith.constant 0 : index
      %c0_32 = arith.constant 0 : index
      %67 = memref.load %arg4[%c0_31, %c0_32] : memref<1x1xf32, #tpu.memory_space<smem>>
      memref.store %66, %arg4[%c0_31, %c0_32] : memref<1x1xf32, #tpu.memory_space<smem>>
    } else {
    }
    return
  }
  func.func @transform_0(%arg0: i32) -> (i32, i32) {
    %c0_i32 = arith.constant 0 : i32
    %c0_i32_0 = arith.constant 0 : i32
    %c0_i32_1 = arith.constant 0 : i32
    return %c0_i32, %c0_i32_0 : i32, i32
  }
  func.func @transform_1(%arg0: i32) -> (i32, i32) {
    %c0_i32 = arith.constant 0 : i32
    %c0_i32_0 = arith.constant 0 : i32
    %c0_i32_1 = arith.constant 0 : i32
    return %c0_i32, %c0_i32_0 : i32, i32
  }
  func.func @transform_2(%arg0: i32) -> (i32, i32) {
    %c0_i32 = arith.constant 0 : i32
    %c0_i32_0 = arith.constant 0 : i32
    %c0_i32_1 = arith.constant 0 : i32
    return %c0_i32, %c0_i32_0 : i32, i32
  }
  func.func @transform_3(%arg0: i32) -> (i32, i32) {
    %c0_i32 = arith.constant 0 : i32
    %c0_i32_0 = arith.constant 0 : i32
    %c0_i32_1 = arith.constant 0 : i32
    return %c0_i32, %c0_i32_0 : i32, i32
  }
}

</mosaic_0001>

<bundles_post_ra>
// kernel: tpu_custom_call.1
= control target key start
LH: loop header
LB: loop body
LE: loop exit
PB: predicated region body
PF: predicated region fallthrough
CT: control target
= control target key end

     0   :  { %8 = vsyncpa [#allocation6], 0  ;;  %s407_s0 = inlined_call_operand.hbm [shape: f32[8,32], index: 0, kind: input, shape index: {}]   ;;  %s408_s1 = inlined_call_operand.hbm [shape: f32[8,16], index: 1, kind: input, shape index: {}]   ;;  %s409_s2 = inlined_call_operand.hbm [shape: f32[8,16], index: 2, kind: input, shape index: {}]   ;;  %s410_s3 = inlined_call_operand.hbm [shape: f32[1,1], index: 3, kind: output, shape index: {}]  }
   0x1   :  { %9 = vsyncpa [#allocation9], 0 }
   0x2   :  { %10 = vsyncpa [#allocation7], 0  ;;  %s360_s12 = smov [#allocation8]   ;;  %s361_s14 = smov [#allocation5]  }
   0x3   :  { %s27_s13 = sshll.u32 %s360_s12, 4  ;;  %s17_s15 = sshll.u32 %s361_s14, 4  ;;  %s28_s13 = int_to_ptr.vmem [resolvable:$true] %s27_s13  ;;  %s18_s15 = int_to_ptr.vmem [resolvable:$true] %s17_s15 }
   0x4   :  { %s294_s16 = scalar_lea.vmem %s28_s13, 128  ;;  %p299_p1 = scmp.lt.s32.totalorder %s28_s13, %s28_s13 }
   0x5   :  { %p295_p0 = scmp.ne.s32.totalorder %s28_s13, %s294_s16  ;;  %p300_p2 = scmp.lt.s32.totalorder %s294_s16, %s294_s16 }
   0x7   :  { %p301_p3 = por %p300_p2, %p299_p1 }
   0x9   :  { %p302_p4 = pnand %p301_p3, %p295_p0 }
   0xb   :  { %305 = shalt.err (!%p302_p4)
}
   0xc   :  { %30 = dma.hbm_to_vmem [thread:$0]  %s408_s1, 128, %s28_s13, [#allocation9]  }
   0xd   :  { %s314_s19 = scalar_lea.vmem %s18_s15, 128  ;;  %p319_p6 = scmp.lt.s32.totalorder %s18_s15, %s18_s15 }
   0xe   :  { %p315_p5 = scmp.ne.s32.totalorder %s18_s15, %s314_s19  ;;  %p320_p7 = scmp.lt.s32.totalorder %s314_s19, %s314_s19 }
  0x10   :  { %p321_p8 = por %p320_p7, %p319_p6 }
  0x12   :  { %p322_p9 = pnand %p321_p8, %p315_p5 }
  0x14   :  { %325 = shalt.err (!%p322_p9)
}
  0x15   :  { %20 = dma.hbm_to_vmem [thread:$0]  %s407_s0, 128, %s18_s15, [#allocation6]  }
  0x16   :  { %s362_s22 = smov [#allocation10]  }
  0x17   :  { %s37_s23 = sshll.u32 %s362_s22, 4  ;;  %s38_s23 = int_to_ptr.vmem [resolvable:$true] %s37_s23 }
  0x18   :  { %s334_s24 = scalar_lea.vmem %s38_s23, 128  ;;  %p339_p11 = scmp.lt.s32.totalorder %s38_s23, %s38_s23 }
  0x19   :  { %p335_p10 = scmp.ne.s32.totalorder %s38_s23, %s334_s24  ;;  %p340_p12 = scmp.lt.s32.totalorder %s334_s24, %s334_s24 }
  0x1b   :  { %p341_p13 = por %p340_p12, %p339_p11 }
  0x1d   :  { %p342_p0 = pnand %p341_p13, %p335_p10 }
  0x1f   :  { %345 = shalt.err (!%p342_p0)
}
  0x20   :  { %40 = dma.hbm_to_vmem [thread:$0]  %s409_s2, 128, %s38_s23, [#allocation9]  }
  0x21   :  { %354 = dma.done.wait [#allocation6], 128  }
  0x22   :  { %355 = vsyncadd [#allocation6], 4294967168 }
  0x23   :  { %356 = dma.done.wait [#allocation9], 256  }
  0x24   :  { %357 = vsyncadd [#allocation9], 4294967040  ;;  %v54_v0 = vld [vmem:[#allocation5] sm:$0xff]  ;;  %vm56_vm0 = vcmask 261120   ;;  %vm65_vm1 = vcmask 7168   ;;  %v363_v3 = vmov 0.0   ;;  %v149_v20 = vlaneseq }
  0x25   :  { %v55_v1 = vmul.f32 %v54_v0, %v54_v0  ;;  %67 = vst.msk [vmem:[#allocation4] sm:$0xff] %vm65_vm1, %v363_v3  ;;  %260 = vmatprep.subr.mxu0 %v363_v3  ;;  %vm364_vm2 = vmmov 0   ;;  %vm180_vm3 = vcmask 257024   ;;  %vm161_vm5 = vcmask 64512   ;;  %v203_v30 = vld [vmem:[#allocation8] sm:$0xff]  ;;  %v204_v31 = vld [vmem:[#allocation10] sm:$0xff] }
  0x26   :  { %262 = vmatprep.mubr.msk.f32.mxu0 %vm364_vm2, %v363_v3  ;;  %v150_v21 = vshrl.u32 %v149_v20, 7  ;;  %v152_v22 = vand.u32 127, %v149_v20  ;;  %v205_v32 = vsub.f32 %v203_v30, %v204_v31  ;;  %vm207_vm6 = vcmask 130048   ;;  %s365_s7 = smov [#allocation11]  }
  0x27   :  { %v57_v2 = vsel %vm56_vm0, %v55_v1, 0.0  ;;  %v221_v39 = vrot.slane %v54_v0, 4 }
  0x28   :  { %58 = vadd.xlane.f32.xlu0 %v57_v2  ;;  %vm155_vm4 = vcmp.eq.s32.totalorder %v150_v21, %v152_v22  ;;  %v206_v33 = vmul.f32 %v205_v32, %v205_v32 }
  0x29   :  { %v223_v40 = vsub.f32 %v54_v0, %v221_v39 }
  0x2a   :  { %v208_v34 = vsel %vm207_vm6, %v206_v33, 0.0 }
  0x2b   :  { %v224_v44 = vmul.f32 %v223_v40, %v223_v40 }
  0x2c   :  { %v157_v35 = vld [vmem:[#allocation4] sm:$0xff] }
  0x2d   :  { %v225_v46 = vsel %vm180_vm3, %v224_v44, 0.0 }
  0xb1   :  { %v59_v4 = vpop.xlane.xlu0 %58 }
  0xb2   :  { %v60_v5 = vmax.f32 %v59_v4, 1e-16 }
  0xb4   :  { %280 = vrsqrt.f32 %v60_v5 }
  0xc1   :  { %v281_v6 = vpop.eup %280 }
  0xc2   :  { %v62_v7 = vmul.f32 3.1622777, %v281_v6 }
  0xc4   :  { %v63_v8 = vmul.f32 %v62_v7, %v54_v0 }
  0xc6   :  { %64 = vst.msk [vmem:[#allocation2] sm:$0xff] %vm56_vm0, %v63_v8 }
  0xcd   :  { %v71_v9 = vld [vmem:[#allocation2] sm:$0xff] }
  0xce   :  { %261 = vmatpush3.xpose.msk.msra.mxu0 %vm56_vm0, %v71_v9  ;;  %v177_v10 = vrot.slane %v71_v9, 4 }
  0xd0   :  { %v179_v11 = vmul.f32 %v177_v10, %v71_v9 }
  0xd1   :  { %263 = vmatmul.mubr.msk.f32.vlgmr.msra.gmra.mxu0 %vm56_vm0, %v71_v9 }
  0xd2   :  { %v181_v12 = vsel %vm180_vm3, %v179_v11, 0.0 }
  0xd3   :  { %182 = vadd.xlane.f32.xlu1 %v181_v12 }
 0x15c   :  { %v183_v13 = vpop.xlane.xlu1 %182 }
 0x15d   :  { %v184_v14 = vrot.slane %v183_v13, 4 }
 0x15f   :  { %v185_v15 = vadd.f32 %v184_v14, %v183_v13 }
 0x161   :  { %v186_v16 = vrot.slane %v185_v15, 2 }
 0x163   :  { %v187_v17 = vadd.f32 %v186_v16, %v185_v15 }
 0x165   :  { %v188_v18 = vrot.slane %v187_v17, 1 }
 0x167   :  { %v189_v19 = vadd.f32 %v188_v18, %v187_v17 }
 0x169   :  { %265 = vpush %v189_v19 }
 0x191   :  { %v145_v23 = vpop.f32.mrf.mxu0 }
 0x192   :  { %v156_v24 = vsel %vm155_vm4, -1e+30, %v145_v23 }
 0x193   :  { %v257_v25 = vadd.f32 -10.0, %v156_v24  ;;  %v264_v26 = vpop.f32.mrf.mxu0 }
 0x195   :  { %v159_v27 = vmul.f32 1.442695, %v257_v25 }
 0x197   :  { %282 = vpow2.f32 %v159_v27 }
 0x19a   :  { %s266_s0 = spop %265 }
 0x19b   :  { %s191_s2 = smul.f32 2.0, %s266_s0 }
 0x1a4   :  { %v283_v28 = vpop.eup %282 }
 0x1a5   :  { %v162_v29 = vsel %vm161_vm5, %v283_v28, 0.0 }
 0x1a6   :  { %163 = vadd.xlane.f32.xlu0 %v162_v29 }
 0x1aa   :  { %209 = vadd.xlane.f32.xlu0 %v208_v34 }
 0x22f   :  { %v164_v36 = vpop.xlane.xlu0 %163 }
 0x230   :  { %v165_v37 = vadd.f32 %v164_v36, %v157_v35 }
 0x232   :  { %167 = vst.msk [vmem:[#allocation4] sm:$0xff] %vm65_vm1, %v165_v37 }
 0x233   :  { %v210_v47 = vpop.xlane.xlu0 %209 }
 0x234   :  { %v211_v48 = vrot.slane %v210_v47, 4 }
 0x236   :  { %v212_v49 = vadd.f32 %v211_v48, %v210_v47 }
 0x238   :  { %v213_v50 = vrot.slane %v212_v49, 2 }
 0x239   :  { %v171_v38 = vld [vmem:[#allocation4] sm:$0xff] }
 0x23a   :  { %284 = vlog2.f32 %v171_v38  ;;  %v214_v54 = vadd.f32 %v213_v50, %v212_v49 }
 0x23c   :  { %v215_v60 = vrot.slane %v214_v54, 1 }
 0x23e   :  { %v216_v1 = vadd.f32 %v215_v60, %v214_v54 }
 0x247   :  { %v285_v41 = vpop.eup %284 }
 0x248   :  { %v173_v42 = vmul.f32 0.6931472, %v285_v41 }
 0x24a   :  { %v174_v43 = vadd.f32 10.0, %v173_v42 }
 0x24c   :  { %v192_v45 = vsel %vm65_vm1, %v174_v43, 0.0 }
 0x24d   :  { %193 = vadd.xlane.f32.xlu1 %v192_v45 }
 0x251   :  { %226 = vadd.xlane.f32.xlu1 %v225_v46 }
 0x2d6   :  { %v194_v51 = vpop.xlane.xlu1 %193 }
 0x2d7   :  { %v195_v52 = vrot.slane %v194_v51, 4 }
 0x2d9   :  { %v196_v53 = vadd.f32 %v195_v52, %v194_v51 }
 0x2da   :  { %v227_v55 = vpop.xlane.xlu1 %226 }
 0x2db   :  { %v197_v56 = vrot.slane %v196_v53, 2  ;;  %v228_v57 = vrot.slane %v227_v55, 4 }
 0x2dd   :  { %v229_v58 = vadd.f32 %v228_v57, %v227_v55  ;;  %v198_v59 = vadd.f32 %v197_v56, %v196_v53 }
 0x2df   :  { %v230_v61 = vrot.slane %v229_v58, 2  ;;  %v199_v62 = vrot.slane %v198_v59, 1 }
 0x2e1   :  { %v231_v63 = vadd.f32 %v230_v61, %v229_v58  ;;  %v200_v0 = vadd.f32 %v199_v62, %v198_v59 }
 0x2e3   :  { %267 = vpush %v200_v0  ;;  %v232_v2 = vrot.slane %v231_v63, 1 }
 0x2e4   :  { %269 = vpush %v216_v1 }
 0x2e5   :  { %v233_v3 = vadd.f32 %v232_v2, %v231_v63 }
 0x2e7   :  { %271 = vpush %v233_v3 }
 0x314   :  { %s268_s26 = spop %267 }
 0x315   :  { %s202_s27 = ssub.f32 %s268_s26, %s191_s2  ;;  %s270_s28 = spop %269 }
 0x316   :  { %s218_s29 = smul.f32 0.0078125, %s270_s28 }
 0x318   :  { %s272_s30 = spop %271  ;;  %s236_s4 = sadd.f32 %s218_s29, %s202_s27 }
 0x319   :  { %s235_s5 = smul.f32 0.25, %s272_s30 }
 0x31b   :  { %s237_s6 = sadd.f32 %s236_s4, %s235_s5 }
 0x31d   :  { %239 = sst [smem:[#allocation11]] %s237_s6 }
 0x31e   :  { %247 = dma.smem_to_hbm %s365_s7, 16, %s410_s3, [#allocation7]  }
 0x31f   :  { %358 = dma.done.wait [#allocation7], 16  }
 0x320   :  { %359 = vsyncadd [#allocation7], 4294967280 }
 0x321   :  { %251 = sfence }
 0x322   :  { %252 = vsyncpa [#allocation6], 1 }
 0x323   :  { %253 = vsyncpa [#allocation9], 1 }
 0x324   :  { %254 = vsyncpa [#allocation7], 1 }

</bundles_post_ra>
